<compile_context>
chip_gen: v5e
topology: v5e:2x2
jax: 0.10.0
libtpu: 0.0.40
codegen_flags: <defaults>
</compile_context>

<pallas_src>
import jax
import jax.numpy as jnp
from jax.experimental import pallas as pl
from jax.experimental.pallas import tpu as pltpu

LANES = 128
TARGET_BLOCK_BYTES = 4 * 1024 * 1024      # ~4 MiB blocks on the aligned path
RAGGED_VMEM_PER_BUF = 6 * 1024 * 1024     # worst-case VMEM per buffer, ragged path
VMEM_LIMIT_BYTES = 32 * 1024 * 1024

_COMPILER_PARAMS = pltpu.CompilerParams(
    dimension_semantics=("parallel",),
    vmem_limit_bytes=VMEM_LIMIT_BYTES,
)


def _hswish_kernel(x_ref, o_ref):
    x = x_ref[...]
    # relu6(x + 3) = clamp(x + 3, 0, 6); hswish = x * that / 6.
    # Python-float literals are weakly typed -> bf16 inputs stay bf16 end-to-end.
    r6 = jnp.clip(x + 3.0, 0.0, 6.0)
    o_ref[...] = x * r6 * (1.0 / 6.0)


def _round_up(a: int, b: int) -> int:
    return ((a + b - 1) // b) * b


def hswish(x: jax.Array) -> jax.Array:
    """HSwish applied elementwise. Accepts any shape (e.g. NCHW), any float dtype."""
    orig_shape = x.shape
    n = x.size
    if n == 0:
        return x

    itemsize = jnp.dtype(x.dtype).itemsize
    # Sublane packing multiple: 8 for 32-bit, 16 for 16-bit, 32 for 8-bit dtypes.
    sub = max(8, 32 // max(itemsize, 1))

    if n % LANES == 0:
        # Fast path: lane-dense (rows, 128) view; reshape of a contiguous array
        # is free, so the wrapper adds zero HBM traffic.
        rows = n // LANES
        x2d = jnp.reshape(x, (rows, LANES))
        # Constant-byte tile: ~4 MiB regardless of dtype.
        tr_target = max(sub, (TARGET_BLOCK_BYTES // (LANES * itemsize)) // sub * sub)
        if rows <= tr_target:
            tr = rows                       # single block == full array (always legal)
        else:
            tr = tr_target
            g = pl.cdiv(rows, tr)
            if g % 2 == 1:                  # balance steps across v7x's 2 TensorCores
                tr = _round_up(pl.cdiv(rows, g + 1), sub)
        grid0 = pl.cdiv(rows, tr)
        out2d = pl.pallas_call(
            _hswish_kernel,
            out_shape=jax.ShapeDtypeStruct((rows, LANES), x2d.dtype),
            grid=(grid0,),
            in_specs=[pl.BlockSpec((tr, LANES), lambda i: (i, 0))],
            out_specs=pl.BlockSpec((tr, LANES), lambda i: (i, 0)),
            compiler_params=_COMPILER_PARAMS,
        )(x2d)
        return jnp.reshape(out2d, orig_shape)

    # Ragged path (rare): (1, n) view, blocked along lanes with a block whose
    # last dim is a multiple of 8*128 (or equal to n itself for tiny inputs).
    # No pad, no slice -> a single read+write of the data instead of ~3x.
    x2d = jnp.reshape(x, (1, n))
    # Cap the block so even a worst-case sublane-padded VMEM layout of the
    # four double-buffered (1, blk) buffers stays within the 32 MiB limit.
    blk_cap = RAGGED_VMEM_PER_BUF // (itemsize * sub)
    blk_target = max(sub * LANES, (blk_cap // (sub * LANES)) * (sub * LANES))
    if n <= blk_target:
        blk = n                             # block == full array dims (always legal)
    else:
        blk = blk_target                    # multiple of sub*128, divisible by 128
    grid0 = pl.cdiv(n, blk)
    out2d = pl.pallas_call(
        _hswish_kernel,
        out_shape=jax.ShapeDtypeStruct((1, n), x2d.dtype),
        grid=(grid0,),
        in_specs=[pl.BlockSpec((1, blk), lambda i: (0, i))],
        out_specs=pl.BlockSpec((1, blk), lambda i: (0, i)),
        compiler_params=_COMPILER_PARAMS,
    )(x2d)
    return jnp.reshape(out2d, orig_shape)


def _ref_hswish(x):
    return x * jnp.clip(x + 3.0, 0.0, 6.0) * (1.0 / 6.0)


if __name__ == "__main__":
    key = jax.random.PRNGKey(0)

    # NCHW input, matching the PyTorch module's expected conv layout.
    x = jax.random.normal(key, (2, 4, 16, 16), dtype=jnp.float32) * 4.0
    out = jax.block_until_ready(hswish(x))
    assert out.shape == x.shape and out.dtype == x.dtype
    assert jnp.allclose(out, _ref_hswish(x), atol=1e-6), "mismatch vs reference (aligned)"

    # Ragged shape (numel % 128 != 0) exercises the (1, n) lane-ragged path.
    x2 = jax.random.normal(jax.random.PRNGKey(1), (2, 3, 5, 7), dtype=jnp.float32) * 4.0
    out2 = jax.block_until_ready(hswish(x2))
    assert out2.shape == x2.shape and out2.dtype == x2.dtype
    assert jnp.allclose(out2, _ref_hswish(x2), atol=1e-6), "mismatch vs reference (ragged)"

    # bf16 exercises the byte-scaled tile sizing / weak-typed literal path.
    x3 = (jax.random.normal(jax.random.PRNGKey(2), (2, 4, 16, 16), dtype=jnp.float32)
          * 4.0).astype(jnp.bfloat16)
    out3 = jax.block_until_ready(hswish(x3))
    assert out3.shape == x3.shape and out3.dtype == x3.dtype
    assert jnp.allclose(out3.astype(jnp.float32),
                        _ref_hswish(x3.astype(jnp.float32)),
                        rtol=5e-2, atol=5e-2), "mismatch vs reference (bf16)"

    print("KERNEL_OK")
</pallas_src>

<mosaic_0001>
module attributes {stable_mosaic.version = 11 : i64} {
  func.func @_hswish_kernel(%arg0: i32, %arg1: memref<16x128xf32, #tpu.memory_space<vmem>>, %arg2: memref<16x128xf32, #tpu.memory_space<vmem>>) attributes {dimension_semantics = [#tpu.dimension_semantics<parallel>], iteration_bounds = array<i64: 1>, scalar_prefetch = 0 : i64, scratch_operands = 0 : i64, tpu.core_type = #tpu.core_type<tc>, window_params = [{transform_indices = @transform_0, window_bounds = array<i64: 16, 128>}, {transform_indices = @transform_1, window_bounds = array<i64: 16, 128>}]} {
    %c0 = arith.constant 0 : index
    %c0_0 = arith.constant 0 : index
    %0 = vector.load %arg1[%c0, %c0_0] : memref<16x128xf32, #tpu.memory_space<vmem>>, vector<16x128xf32>
    %cst = arith.constant 3.000000e+00 : f32
    %1 = vector.broadcast %cst : f32 to vector<16x128xf32>
    %2 = arith.addf %0, %1 : vector<16x128xf32>
    %cst_1 = arith.constant 0.000000e+00 : f32
    %cst_2 = arith.constant 6.000000e+00 : f32
    %3 = vector.broadcast %cst_1 : f32 to vector<16x128xf32>
    %4 = arith.maximumf %3, %2 : vector<16x128xf32>
    %5 = vector.broadcast %cst_2 : f32 to vector<16x128xf32>
    %6 = arith.minimumf %5, %4 : vector<16x128xf32>
    %7 = arith.mulf %0, %6 : vector<16x128xf32>
    %cst_3 = arith.constant 0.166666672 : f32
    %8 = vector.broadcast %cst_3 : f32 to vector<16x128xf32>
    %9 = arith.mulf %7, %8 : vector<16x128xf32>
    %c0_4 = arith.constant 0 : index
    %c0_5 = arith.constant 0 : index
    %10 = vector.load %arg2[%c0_4, %c0_5] : memref<16x128xf32, #tpu.memory_space<vmem>>, vector<16x128xf32>
    tpu.vector_store %arg2[%c0_4, %c0_5], %9 {strides = array<i32>} : memref<16x128xf32, #tpu.memory_space<vmem>>, vector<16x128xf32>,
    return
  }
  func.func @transform_0(%arg0: i32) -> (i32, i32) {
    %c0_i32 = arith.constant 0 : i32
    %c0_i32_0 = arith.constant 0 : i32
    return %arg0, %c0_i32 : i32, i32
  }
  func.func @transform_1(%arg0: i32) -> (i32, i32) {
    %c0_i32 = arith.constant 0 : i32
    %c0_i32_0 = arith.constant 0 : i32
    return %arg0, %c0_i32 : i32, i32
  }
}

</mosaic_0001>

<bundles_post_ra>
// kernel: tpu_custom_call.1
= control target key start
LH: loop header
LB: loop body
LE: loop exit
PB: predicated region body
PF: predicated region fallthrough
CT: control target
= control target key end

     0   :  { %6 = vsyncpa [#allocation3], 0  ;;  %s134_s0 = inlined_call_operand.hbm [shape: f32[16,128], index: 0, kind: input, shape index: {}]   ;;  %s135_s1 = inlined_call_operand.hbm [shape: f32[16,128], index: 1, kind: output, shape index: {}]  }
   0x1   :  { %7 = vsyncpa [#allocation4], 0  ;;  %s12_s8 = sshll.u32 %s134_s0, 4  ;;  %s114_s9 = smov [#allocation2]   ;;  %s13_s8 = int_to_ptr.hbm [resolvable:$true] %s12_s8 }
   0x2   :  { %s14_s10 = sshll.u32 %s114_s9, 4  ;;  %s115_s11 = smov 128   ;;  %s15_s10 = int_to_ptr.vmem [resolvable:$true] %s14_s10 }
   0x3   :  { %s116_s12 = smov 8  }
   0x4   :  { %20 = dma.hbm_to_vmem [thread:$0]  %s13_s8, 256, %s15_s10, [#allocation3], %s115_s11, %s115_s11, %s116_s12  }
   0x5   :  { %110 = dma.done.wait [#allocation3], 256  }
   0x6   :  { %111 = vsyncadd [#allocation3], 4294967040  ;;  %v25_v0 = vld [vmem:[#allocation2] sm:$0xff]  ;;  %v26_v1 = vld [vmem:[#allocation2 + $0x8] sm:$0xff]  ;;  %s117_s0 = smov [#allocation5]   ;;  %s45_s16 = sshll.u32 %s135_s1, 4  ;;  %s46_s16 = int_to_ptr.hbm [resolvable:$true] %s45_s16 }
   0x7   :  { %v27_v2 = vadd.f32 3.0, %v25_v0  ;;  %v28_v3 = vadd.f32 3.0, %v26_v1  ;;  %s43_s13 = sshll.u32 %s117_s0, 4  ;;  %s44_s13 = int_to_ptr.vmem [resolvable:$true] %s43_s13 }
   0x9   :  { %v29_v4 = vmax.f32 %v27_v2, 0.0  ;;  %v30_v5 = vmax.f32 %v28_v3, 0.0 }
   0xb   :  { %v31_v6 = vmin.f32 %v29_v4, 6.0  ;;  %v32_v7 = vmin.f32 %v30_v5, 6.0 }
   0xd   :  { %v33_v8 = vmul.f32 %v31_v6, %v25_v0  ;;  %v34_v9 = vmul.f32 %v32_v7, %v26_v1 }
   0xf   :  { %v35_v10 = vmul.f32 0.16666667, %v33_v8  ;;  %v36_v11 = vmul.f32 0.16666667, %v34_v9 }
  0x11   :  { %37 = vst [vmem:[#allocation5] sm:$0xff] %v35_v10 }
  0x12   :  { %38 = vst [vmem:[#allocation5 + $0x8] sm:$0xff] %v36_v11 }
  0x13   :  { %51 = dma.vmem_to_hbm [thread:$0]  %s44_s13, 256, %s46_s16, [#allocation4], %s115_s11, %s115_s11, %s116_s12  }
  0x14   :  { %112 = dma.done.wait [#allocation4], 256  }
  0x15   :  { %113 = vsyncadd [#allocation4], 4294967040 }
  0x16   :  { %56 = vsyncpa [#allocation3], 1 }
  0x17   :  { %57 = vsyncpa [#allocation4], 1 }

</bundles_post_ra>
